<compile_context>
chip_gen: v7x
topology: tpu7x:2x2x1
jax: 0.10.0
libtpu: 0.0.40
codegen_flags: <defaults>
</compile_context>

<pallas_src>
import functools

import jax
import jax.numpy as jnp
from jax.experimental import pallas as pl
from jax.experimental.pallas import tpu as pltpu


_TARGET_TILE_BYTES = 4 * 1024 * 1024    # ~4 MiB per pipelined block
_VMEM_LIMIT_BYTES = 32 * 1024 * 1024    # 3 arrays x 2 bufs x 4 MiB = 24 MiB < 32 MiB
_MIN_PALLAS_ELEMENTS = 1 << 15          # below this, fused XLA wins (launch overhead)
_LANE_CANDIDATES = (1024, 512, 256, 128)


def _ema_kernel(ema_ref, x_ref, out_ref, *, alpha):
    # out = alpha * ema + (1 - alpha) * x, accumulated in f32.
    ema = ema_ref[...].astype(jnp.float32)
    x = x_ref[...].astype(jnp.float32)
    out_ref[...] = (alpha * ema + (1.0 - alpha) * x).astype(out_ref.dtype)


def _blend_jnp(ema, x, alpha):
    out = alpha * ema.astype(jnp.float32) + (1.0 - alpha) * x.astype(jnp.float32)
    return out.astype(ema.dtype)


def _pick_lanes(total):
    """Largest lane-dense width (multiple of 128) that exactly divides total."""
    for lanes in _LANE_CANDIDATES:
        if total > 0 and total % lanes == 0:
            return lanes
    return None


def _pick_row_block(rows, lanes, itemsize):
    """Row-block: multiple of the dtype sublane granule, ~4 MiB, >=2 grid steps."""
    granule = max(8, 32 // itemsize)       # 8 for f32, 16 for bf16, 32 for int8/fp8
    if rows <= granule:
        return rows                        # single full-array block (allowed)
    tr = (_TARGET_TILE_BYTES // (lanes * itemsize)) // granule * granule
    tr = max(granule, tr)
    half = (rows // 2) // granule * granule
    if half >= granule:                    # keep the grid >= 2 steps (v7x megacore,
        tr = min(tr, half)                 # and writeback/fetch overlap everywhere)
    return tr


@functools.partial(jax.jit, static_argnames=("alpha", "use_pallas"), donate_argnums=(0,))
def _ema_update_jit(ema, x, *, alpha, use_pallas):
    total = ema.size
    lanes = _pick_lanes(total)
    if (not use_pallas) or lanes is None:
        # Tiny or non-128-alignable tensor: a fused, donated XLA blend is already
        # near the HBM roofline and avoids any pad/slice copies entirely.
        return _blend_jnp(ema, x, alpha)

    itemsize = jnp.dtype(ema.dtype).itemsize
    rows = total // lanes
    tr = _pick_row_block(rows, lanes, itemsize)
    grid = (pl.cdiv(rows, tr),)            # partial last block handled by masking

    ema2 = ema.reshape(rows, lanes)        # bitcast view: no HBM traffic
    x2 = x.reshape(rows, lanes)

    out2 = pl.pallas_call(
        functools.partial(_ema_kernel, alpha=alpha),
        out_shape=jax.ShapeDtypeStruct((rows, lanes), ema.dtype),
        grid=grid,
        in_specs=[
            pl.BlockSpec((tr, lanes), lambda i: (i, 0)),
            pl.BlockSpec((tr, lanes), lambda i: (i, 0)),
        ],
        out_specs=pl.BlockSpec((tr, lanes), lambda i: (i, 0)),
        # Old EMA state is donated at the jit boundary -> true in-place update.
        input_output_aliases={0: 0},
        compiler_params=pltpu.CompilerParams(
            dimension_semantics=("parallel",),
            vmem_limit_bytes=_VMEM_LIMIT_BYTES,
        ),
    )(ema2, x2)
    return out2.reshape(ema.shape)


def ema_update(ema, x, alpha, *, use_pallas=None):
    """One EMA step: alpha * ema + (1 - alpha) * x.

    NOTE: `ema` is donated (consumed); callers must not reuse the old array.
    """
    assert ema.shape == x.shape and ema.dtype == x.dtype
    if use_pallas is None:
        use_pallas = ema.size >= _MIN_PALLAS_ELEMENTS
    return _ema_update_jit(ema, x, alpha=float(alpha), use_pallas=bool(use_pallas))


class EMAModule:
    """Stateful wrapper matching the PyTorch EMA_module forward."""

    def __init__(self, alpha=0.9, use_pallas=None):
        self.alpha = alpha
        self.use_pallas = use_pallas
        self.ema = None  # registered buffer, initially None

    def __call__(self, x):
        if self.ema is None:
            # torch: self.ema = x.clone().  Copy so that later donation of the
            # EMA state never invalidates the caller's x.
            self.ema = jnp.array(x, copy=True)
        else:
            self.ema = ema_update(self.ema, x, self.alpha, use_pallas=self.use_pallas)
        return self.ema


if __name__ == "__main__":
    key = jax.random.PRNGKey(0)
    k1, k2, k3, k4, k5, k6, k7 = jax.random.split(key, 7)
    alpha = 0.9

    # --- Module test at the small suggested shape, forcing the Pallas path ---
    B, C, H, W = 2, 4, 16, 16                       # 2048 elems -> (2, 1024) slab
    x0 = jax.random.normal(k1, (B, C, H, W), dtype=jnp.float32)
    x1 = jax.random.normal(k2, (B, C, H, W), dtype=jnp.float32)
    x2 = jax.random.normal(k3, (B, C, H, W), dtype=jnp.float32)

    mod = EMAModule(alpha=alpha, use_pallas=True)
    _ = mod(x0)      # first call: ema = clone(x0)
    _ = mod(x1)      # Pallas blend (old ema donated in place)
    y2 = mod(x2)     # Pallas blend
    jax.block_until_ready(y2)

    ref = x0
    ref = alpha * ref + (1.0 - alpha) * x1
    ref = alpha * ref + (1.0 - alpha) * x2
    assert jnp.allclose(y2, ref, atol=1e-6, rtol=1e-6), "module mismatch vs reference"

    # --- Multi-step grid with a partial last block (3200 elems -> rows=25, tr=8) ---
    a = jax.random.normal(k4, (2, 4, 20, 20), dtype=jnp.float32)
    b = jax.random.normal(k5, (2, 4, 20, 20), dtype=jnp.float32)
    ref2 = alpha * a + (1.0 - alpha) * b            # compute BEFORE `a` is donated
    out = ema_update(a, b, alpha, use_pallas=True)
    jax.block_until_ready(out)
    assert jnp.allclose(out, ref2, atol=1e-6, rtol=1e-6), "partial-block path mismatch"

    # --- bf16 state (sublane granule 16), full-array block ---
    c = jax.random.normal(k6, (2, 4, 32, 32), dtype=jnp.float32).astype(jnp.bfloat16)
    d = jax.random.normal(k7, (2, 4, 32, 32), dtype=jnp.float32).astype(jnp.bfloat16)
    ref3 = (alpha * c.astype(jnp.float32)
            + (1.0 - alpha) * d.astype(jnp.float32)).astype(jnp.bfloat16)
    out3 = ema_update(c, d, alpha, use_pallas=True)
    jax.block_until_ready(out3)
    assert jnp.allclose(out3.astype(jnp.float32), ref3.astype(jnp.float32),
                        atol=1e-2, rtol=1e-2), "bf16 path mismatch"

    print("KERNEL_OK")
</pallas_src>

<mosaic_0001>
module attributes {stable_mosaic.version = 11 : i64} {
  func.func @_ema_kernel(%arg0: i32, %arg1: memref<2x1024xf32, #tpu.memory_space<vmem>>, %arg2: memref<2x1024xf32, #tpu.memory_space<vmem>>, %arg3: memref<2x1024xf32, #tpu.memory_space<vmem>>) attributes {dimension_semantics = [#tpu.dimension_semantics<parallel>], iteration_bounds = array<i64: 1>, scalar_prefetch = 0 : i64, scratch_operands = 0 : i64, tpu.core_type = #tpu.core_type<tc>, window_params = [{transform_indices = @transform_0, window_bounds = array<i64: 2, 1024>}, {transform_indices = @transform_1, window_bounds = array<i64: 2, 1024>}, {transform_indices = @transform_2, window_bounds = array<i64: 2, 1024>}]} {
    %c0 = arith.constant 0 : index
    %c0_0 = arith.constant 0 : index
    %0 = vector.load %arg1[%c0, %c0_0] : memref<2x1024xf32, #tpu.memory_space<vmem>>, vector<2x1024xf32>
    %c0_1 = arith.constant 0 : index
    %c0_2 = arith.constant 0 : index
    %1 = vector.load %arg2[%c0_1, %c0_2] : memref<2x1024xf32, #tpu.memory_space<vmem>>, vector<2x1024xf32>
    %cst = arith.constant 0.899999976 : f32
    %2 = vector.broadcast %cst : f32 to vector<2x1024xf32>
    %3 = arith.mulf %2, %0 : vector<2x1024xf32>
    %cst_3 = arith.constant 1.000000e-01 : f32
    %4 = vector.broadcast %cst_3 : f32 to vector<2x1024xf32>
    %5 = arith.mulf %4, %1 : vector<2x1024xf32>
    %6 = arith.addf %3, %5 : vector<2x1024xf32>
    %c0_4 = arith.constant 0 : index
    %c0_5 = arith.constant 0 : index
    %7 = vector.load %arg3[%c0_4, %c0_5] : memref<2x1024xf32, #tpu.memory_space<vmem>>, vector<2x1024xf32>
    tpu.vector_store %arg3[%c0_4, %c0_5], %6 {strides = array<i32>} : memref<2x1024xf32, #tpu.memory_space<vmem>>, vector<2x1024xf32>,
    return
  }
  func.func @transform_0(%arg0: i32) -> (i32, i32) {
    %c0_i32 = arith.constant 0 : i32
    %c0_i32_0 = arith.constant 0 : i32
    return %arg0, %c0_i32 : i32, i32
  }
  func.func @transform_1(%arg0: i32) -> (i32, i32) {
    %c0_i32 = arith.constant 0 : i32
    %c0_i32_0 = arith.constant 0 : i32
    return %arg0, %c0_i32 : i32, i32
  }
  func.func @transform_2(%arg0: i32) -> (i32, i32) {
    %c0_i32 = arith.constant 0 : i32
    %c0_i32_0 = arith.constant 0 : i32
    return %arg0, %c0_i32 : i32, i32
  }
}

</mosaic_0001>

<bundles_post_ra>
// kernel: _ema_update_jit.1
= control target key start
LH: loop header
LB: loop body
LE: loop exit
PB: predicated region body
PF: predicated region fallthrough
CT: control target
= control target key end

     0   :  { %s60_s0 = inlined_call_operand.vmem [shape: f32[2,1024], index: 0, kind: input, shape index: {}, may-alias: {0,2}]   ;;  %s61_s1 = inlined_call_operand.vmem [shape: f32[2,1024], index: 1, kind: input, shape index: {}]   ;;  %s62_s2 = inlined_call_operand.vmem [shape: f32[2,1024], index: 2, kind: output, shape index: {}, may-alias: {0,2}]  }
   0x1   :  { %v11_v0 = vld [vmem:[%s60_s0] sm:$0xff]  ;;  %v12_v2 = vld [vmem:[%s60_s0 + $0x8] sm:$0xff] }
   0x2   :  { %v13_v1 = vld [vmem:[%s61_s1] sm:$0xff]  ;;  %v15_v3 = vmul.f32 0.9, %v11_v0  ;;  %v14_v5 = vld [vmem:[%s61_s1 + $0x8] sm:$0xff]  ;;  %v16_v6 = vmul.f32 0.9, %v12_v2 }
   0x3   :  { %v17_v4 = vmul.f32 0.1, %v13_v1  ;;  %v18_v7 = vmul.f32 0.1, %v14_v5 }
   0x5   :  { %v19_v8 = vadd.f32 %v17_v4, %v15_v3  ;;  %v20_v9 = vadd.f32 %v18_v7, %v16_v6 }
   0x7   :  { %21 = vst [vmem:[%s62_s2] sm:$0xff] %v19_v8  ;;  %22 = vst [vmem:[%s62_s2 + $0x8] sm:$0xff] %v20_v9 }

</bundles_post_ra>
